<compile_context>
chip_gen: v5e
topology: v5e:2x2
jax: 0.10.0
libtpu: 0.0.40
codegen_flags: <defaults>
</compile_context>

<pallas_src>
import numpy as np
import jax
import jax.numpy as jnp
from jax import lax
from jax.experimental import pallas as pl
from jax.experimental.pallas import tpu as pltpu


def _make_feature_kernel(H, W, layer_groups):
    """Fused 3x (3x3 conv, pad=1, bias, ReLU) kernel, spatial-last (C, L) layout.

    `layer_groups` = (g1, g2, g3): number of K-chunks (1 or 3) per conv layer.
    """

    def kernel(mask_ref, x_ref, w1_ref, b1_ref, w2_ref, b2_ref,
               w3_ref, b3_ref, o_ref):
        # Hoist the 9 precomputed boundary-mask rows once; reused by all layers.
        mask_rows = [mask_ref[k:k + 1, :] for k in range(9)]

        def tap(a, k):
            """k-th 3x3 tap of a (Cin, L) activation: lane roll + boundary mask."""
            L = a.shape[1]
            dh, dw = k // 3 - 1, k % 3 - 1
            shift = (-(dh * W + dw)) % L
            t = a if shift == 0 else pltpu.roll(a, shift=shift, axis=1)
            if dh != 0 or dw != 0:
                t = t * mask_rows[k]          # (1, L) broadcast over Cin sublanes
            return t

        def conv3x3_relu(a, w_ref, b_ref, n_groups):
            # w_ref: (n_groups, Cout, group_K) with tap-major / Cin-minor columns.
            tpg = 9 // n_groups               # taps per K-chunk
            acc = None
            for g in range(n_groups):
                cols = jnp.concatenate(
                    [tap(a, k) for k in range(g * tpg, (g + 1) * tpg)], axis=0)
                part = jnp.dot(w_ref[g], cols,
                               preferred_element_type=jnp.float32)
                acc = part if acc is None else acc + part
            return jnp.maximum(acc + b_ref[...], 0.0)

        a = x_ref[0]                                        # (Cin_pad, L) in VMEM
        a = conv3x3_relu(a, w1_ref, b1_ref, layer_groups[0])  # (C1, L) on-chip
        a = conv3x3_relu(a, w2_ref, b2_ref, layer_groups[1])  # (C2, L) on-chip
        a = conv3x3_relu(a, w3_ref, b3_ref, layer_groups[2])  # (C3, L)
        o_ref[0] = a.astype(o_ref.dtype)                    # lane-dense stores

    return kernel


def _n_groups(cin, L):
    """Chunk the im2col K dim (3 groups) if the live cols slab would spill vregs."""
    cols_vregs = (-(-(9 * cin) // 8)) * (-(-L // 128))
    return 3 if cols_vregs > 20 else 1


def _prep_conv_params(w_hwio, b, n_groups, cin_pad=None):
    """HWIO (3,3,Cin,Cout) -> (n_groups, Cout, 9*Cin'/n_groups); bias -> (Cout, 1).

    Columns are tap-major (kh, kw), Cin-minor, matching the kernel's im2col order.
    Cin is optionally zero-padded to a full 8-sublane tile.
    """
    kh, kw, cin, cout = w_hwio.shape
    w_r = jnp.transpose(w_hwio, (3, 0, 1, 2))               # (Cout, kh, kw, Cin)
    if cin_pad is not None and cin_pad > cin:
        w_r = jnp.pad(w_r, ((0, 0), (0, 0), (0, 0), (0, cin_pad - cin)))
        cin = cin_pad
    k_total = kh * kw * cin
    w_r = (w_r.reshape(cout, n_groups, k_total // n_groups)
              .transpose(1, 0, 2))                          # (n_groups, Cout, gK)
    return w_r, b.reshape(cout, 1)


def _build_masks(H, W, fold):
    """Trace-time (numpy) per-tap boundary masks over the folded lane axis (9, L).

    Using (lane % HW) makes every tap that would wrap across an image boundary a
    masked boundary tap, so batch folding is exact.
    """
    HW = H * W
    L = fold * HW
    p = np.arange(L) % HW
    row, col = p // W, p % W
    masks = np.ones((9, L), np.float32)
    k = 0
    for dh in (-1, 0, 1):
        for dw in (-1, 0, 1):
            m = np.ones(L, np.bool_)
            if dh < 0:
                m &= row >= -dh
            elif dh > 0:
                m &= row < H - dh
            if dw < 0:
                m &= col >= -dw
            elif dw > 0:
                m &= col < W - dw
            masks[k] = m
            k += 1
    return masks


@jax.jit
def feature_extractor_forward(x_nchw, params):
    """Mirrors FeatureExtractor.forward: conv1-ReLU-conv2-ReLU-conv3-ReLU (NCHW)."""
    (w1, b1), (w2, b2), (w3, b3) = params
    N, c_in, H, W = x_nchw.shape
    HW = H * W
    c3 = w3.shape[-1]

    # Batch folding: keep a 2-wide parallel grid when possible (v7x has 2 TCs),
    # fold the rest of the batch into the lane axis of each step.
    if N >= 2 and N % 2 == 0:
        n_steps = 2
    else:
        n_steps = max(N, 1)   # TODO(synk): remainder folding for odd batches > 1
    fold = max(N // n_steps, 1)
    L = fold * HW

    # Align layer-1 Cin to a full f32 sublane tile (8).
    cin_pad = max(8, -(-c_in // 8) * 8)

    g1 = _n_groups(cin_pad, L)
    g2 = _n_groups(w2.shape[2], L)
    g3 = _n_groups(w3.shape[2], L)

    w1r, b1r = _prep_conv_params(w1, b1, g1, cin_pad=cin_pad)
    w2r, b2r = _prep_conv_params(w2, b2, g2)
    w3r, b3r = _prep_conv_params(w3, b3, g3)

    x_flat = x_nchw.reshape(N, c_in, HW)                    # free reshape
    if cin_pad > c_in:
        x_flat = jnp.pad(x_flat, ((0, 0), (0, cin_pad - c_in), (0, 0)))
    # Fold `fold` images into the lane axis: (n_steps, Cin_pad, fold*HW).
    x_folded = (x_flat.reshape(n_steps, fold, cin_pad, HW)
                      .transpose(0, 2, 1, 3)
                      .reshape(n_steps, cin_pad, L))

    masks = jnp.asarray(_build_masks(H, W, fold))           # (9, L) constant

    out = pl.pallas_call(
        _make_feature_kernel(H, W, (g1, g2, g3)),
        out_shape=jax.ShapeDtypeStruct((n_steps, c3, L), x_nchw.dtype),
        grid_spec=pltpu.PrefetchScalarGridSpec(
            num_scalar_prefetch=0,
            grid=(n_steps,),
            in_specs=[
                pl.BlockSpec((9, L), lambda n: (0, 0)),              # masks
                pl.BlockSpec((1, cin_pad, L), lambda n: (n, 0, 0)),  # activations
                pl.BlockSpec(w1r.shape, lambda n: (0, 0, 0)),
                pl.BlockSpec(b1r.shape, lambda n: (0, 0)),
                pl.BlockSpec(w2r.shape, lambda n: (0, 0, 0)),
                pl.BlockSpec(b2r.shape, lambda n: (0, 0)),
                pl.BlockSpec(w3r.shape, lambda n: (0, 0, 0)),
                pl.BlockSpec(b3r.shape, lambda n: (0, 0)),
            ],
            out_specs=pl.BlockSpec((1, c3, L), lambda n: (n, 0, 0)),
        ),
        compiler_params=pltpu.CompilerParams(
            dimension_semantics=("parallel",),               # batch across TCs (v7x)
        ),
    )(masks, x_folded, w1r, b1r, w2r, b2r, w3r, b3r)

    # Unfold: (n_steps, C3, fold*HW) -> (N, C3, H, W).
    return (out.reshape(n_steps, c3, fold, HW)
               .transpose(0, 2, 1, 3)
               .reshape(N, c3, H, W))


def init_params(key, c_in=4, c1=8, c2=16, c3=32):
    """Deterministic synthetic parameters for conv1/conv2/conv3 (3x3, pad=1)."""
    ks = jax.random.split(key, 6)

    def conv_init(kw, kb, cin, cout):
        fan_in = cin * 3 * 3
        scale = 1.0 / jnp.sqrt(jnp.asarray(fan_in, jnp.float32))
        w = jax.random.uniform(kw, (3, 3, cin, cout), jnp.float32, -scale, scale)
        b = jax.random.uniform(kb, (cout,), jnp.float32, -scale, scale)
        return w, b

    w1, b1 = conv_init(ks[0], ks[1], c_in, c1)
    w2, b2 = conv_init(ks[2], ks[3], c1, c2)
    w3, b3 = conv_init(ks[4], ks[5], c2, c3)
    return (w1, b1), (w2, b2), (w3, b3)


def _reference_forward(x_nchw, params):
    """Pure-JAX/XLA reference: 3x (3x3 conv, pad=1, stride=1) + bias + ReLU."""
    y = x_nchw
    for w_hwio, b in params:
        w_oihw = jnp.transpose(w_hwio, (3, 2, 0, 1))
        y = lax.conv_general_dilated(
            y, w_oihw, window_strides=(1, 1), padding=((1, 1), (1, 1)),
            dimension_numbers=("NCHW", "OIHW", "NCHW"),
            precision=lax.Precision.HIGHEST)
        y = jnp.maximum(y + b.reshape(1, -1, 1, 1), 0.0)
    return y


if __name__ == "__main__":
    key = jax.random.PRNGKey(0)
    k_x, k_p = jax.random.split(key)

    # Small shapes consistent with the module: batch=2, channels=4, spatial=16x16.
    x = jax.random.normal(k_x, (2, 4, 16, 16), dtype=jnp.float32)
    params = init_params(k_p, c_in=4, c1=8, c2=16, c3=32)

    out = feature_extractor_forward(x, params)
    out = jax.block_until_ready(out)

    assert out.shape == (2, 32, 16, 16), out.shape
    assert out.dtype == jnp.float32
    assert bool(jnp.all(out >= 0.0))  # ReLU output is non-negative

    ref = _reference_forward(x, params)
    max_err = float(jnp.max(jnp.abs(out - ref)))
    assert max_err < 2e-3, f"mismatch vs XLA conv reference: {max_err}"

    print("KERNEL_OK")
</pallas_src>

<mosaic_0001>
module attributes {stable_mosaic.version = 11 : i64} {
  func.func @kernel(%arg0: i32, %arg1: memref<9x256xf32, #tpu.memory_space<vmem>>, %arg2: memref<1x8x256xf32, #tpu.memory_space<vmem>>, %arg3: memref<1x8x72xf32, #tpu.memory_space<vmem>>, %arg4: memref<8x1xf32, #tpu.memory_space<vmem>>, %arg5: memref<1x16x72xf32, #tpu.memory_space<vmem>>, %arg6: memref<16x1xf32, #tpu.memory_space<vmem>>, %arg7: memref<3x32x48xf32, #tpu.memory_space<vmem>>, %arg8: memref<32x1xf32, #tpu.memory_space<vmem>>, %arg9: memref<1x32x256xf32, #tpu.memory_space<vmem>>) attributes {dimension_semantics = [#tpu.dimension_semantics<parallel>], iteration_bounds = array<i64: 2>, scalar_prefetch = 0 : i64, scratch_operands = 0 : i64, tpu.core_type = #tpu.core_type<tc>, window_params = [{pipeline_mode = #tpu.pipeline_mode<synchronous>, transform_indices = @transform_0, window_bounds = array<i64: 9, 256>}, {transform_indices = @transform_1, window_bounds = array<i64: 1, 8, 256>}, {pipeline_mode = #tpu.pipeline_mode<synchronous>, transform_indices = @transform_2, window_bounds = array<i64: 1, 8, 72>}, {pipeline_mode = #tpu.pipeline_mode<synchronous>, transform_indices = @transform_3, window_bounds = array<i64: 8, 1>}, {pipeline_mode = #tpu.pipeline_mode<synchronous>, transform_indices = @transform_4, window_bounds = array<i64: 1, 16, 72>}, {pipeline_mode = #tpu.pipeline_mode<synchronous>, transform_indices = @transform_5, window_bounds = array<i64: 16, 1>}, {pipeline_mode = #tpu.pipeline_mode<synchronous>, transform_indices = @transform_6, window_bounds = array<i64: 3, 32, 48>}, {pipeline_mode = #tpu.pipeline_mode<synchronous>, transform_indices = @transform_7, window_bounds = array<i64: 32, 1>}, {transform_indices = @transform_8, window_bounds = array<i64: 1, 32, 256>}]} {
    %c0 = arith.constant 0 : index
    %c0_0 = arith.constant 0 : index
    %0 = vector.load %arg1[%c0, %c0_0] : memref<9x256xf32, #tpu.memory_space<vmem>>, vector<1x256xf32>
    %c1 = arith.constant 1 : index
    %c0_1 = arith.constant 0 : index
    %1 = vector.load %arg1[%c1, %c0_1] : memref<9x256xf32, #tpu.memory_space<vmem>>, vector<1x256xf32>
    %c2 = arith.constant 2 : index
    %c0_2 = arith.constant 0 : index
    %2 = vector.load %arg1[%c2, %c0_2] : memref<9x256xf32, #tpu.memory_space<vmem>>, vector<1x256xf32>
    %c3 = arith.constant 3 : index
    %c0_3 = arith.constant 0 : index
    %3 = vector.load %arg1[%c3, %c0_3] : memref<9x256xf32, #tpu.memory_space<vmem>>, vector<1x256xf32>
    %c5 = arith.constant 5 : index
    %c0_4 = arith.constant 0 : index
    %4 = vector.load %arg1[%c5, %c0_4] : memref<9x256xf32, #tpu.memory_space<vmem>>, vector<1x256xf32>
    %c6 = arith.constant 6 : index
    %c0_5 = arith.constant 0 : index
    %5 = vector.load %arg1[%c6, %c0_5] : memref<9x256xf32, #tpu.memory_space<vmem>>, vector<1x256xf32>
    %c7 = arith.constant 7 : index
    %c0_6 = arith.constant 0 : index
    %6 = vector.load %arg1[%c7, %c0_6] : memref<9x256xf32, #tpu.memory_space<vmem>>, vector<1x256xf32>
    %c8 = arith.constant 8 : index
    %c0_7 = arith.constant 0 : index
    %7 = vector.load %arg1[%c8, %c0_7] : memref<9x256xf32, #tpu.memory_space<vmem>>, vector<1x256xf32>
    %c0_8 = arith.constant 0 : index
    %c0_9 = arith.constant 0 : index
    %c0_10 = arith.constant 0 : index
    %8 = vector.load %arg2[%c0_8, %c0_9, %c0_10] : memref<1x8x256xf32, #tpu.memory_space<vmem>>, vector<1x8x256xf32>
    %9 = vector.shape_cast %8 : vector<1x8x256xf32> to vector<8x256xf32>
    %c17_i32 = arith.constant 17 : i32
    %10 = tpu.dynamic_rotate %9 by %c17_i32 dim 1 : vector<8x256xf32>, i32 -> vector<8x256xf32>
    %11 = vector.broadcast %0 : vector<1x256xf32> to vector<8x256xf32>
    %12 = arith.mulf %10, %11 : vector<8x256xf32>
    %c16_i32 = arith.constant 16 : i32
    %13 = tpu.dynamic_rotate %9 by %c16_i32 dim 1 : vector<8x256xf32>, i32 -> vector<8x256xf32>
    %14 = vector.broadcast %1 : vector<1x256xf32> to vector<8x256xf32>
    %15 = arith.mulf %13, %14 : vector<8x256xf32>
    %c15_i32 = arith.constant 15 : i32
    %16 = tpu.dynamic_rotate %9 by %c15_i32 dim 1 : vector<8x256xf32>, i32 -> vector<8x256xf32>
    %17 = vector.broadcast %2 : vector<1x256xf32> to vector<8x256xf32>
    %18 = arith.mulf %16, %17 : vector<8x256xf32>
    %c1_i32 = arith.constant 1 : i32
    %19 = tpu.dynamic_rotate %9 by %c1_i32 dim 1 : vector<8x256xf32>, i32 -> vector<8x256xf32>
    %20 = vector.broadcast %3 : vector<1x256xf32> to vector<8x256xf32>
    %21 = arith.mulf %19, %20 : vector<8x256xf32>
    %c255_i32 = arith.constant 255 : i32
    %22 = tpu.dynamic_rotate %9 by %c255_i32 dim 1 : vector<8x256xf32>, i32 -> vector<8x256xf32>
    %23 = vector.broadcast %4 : vector<1x256xf32> to vector<8x256xf32>
    %24 = arith.mulf %22, %23 : vector<8x256xf32>
    %c241_i32 = arith.constant 241 : i32
    %25 = tpu.dynamic_rotate %9 by %c241_i32 dim 1 : vector<8x256xf32>, i32 -> vector<8x256xf32>
    %26 = vector.broadcast %5 : vector<1x256xf32> to vector<8x256xf32>
    %27 = arith.mulf %25, %26 : vector<8x256xf32>
    %c240_i32 = arith.constant 240 : i32
    %28 = tpu.dynamic_rotate %9 by %c240_i32 dim 1 : vector<8x256xf32>, i32 -> vector<8x256xf32>
    %29 = vector.broadcast %6 : vector<1x256xf32> to vector<8x256xf32>
    %30 = arith.mulf %28, %29 : vector<8x256xf32>
    %c239_i32 = arith.constant 239 : i32
    %31 = tpu.dynamic_rotate %9 by %c239_i32 dim 1 : vector<8x256xf32>, i32 -> vector<8x256xf32>
    %32 = vector.broadcast %7 : vector<1x256xf32> to vector<8x256xf32>
    %33 = arith.mulf %31, %32 : vector<8x256xf32>
    %34 = tpu.concatenate %12, %15, %18, %21, %9, %24, %27, %30, %33 in 0 : vector<8x256xf32>, vector<8x256xf32>, vector<8x256xf32>, vector<8x256xf32>, vector<8x256xf32>, vector<8x256xf32>, vector<8x256xf32>, vector<8x256xf32>, vector<8x256xf32> -> vector<72x256xf32>
    %c0_11 = arith.constant 0 : index
    %c0_12 = arith.constant 0 : index
    %c0_13 = arith.constant 0 : index
    %35 = vector.load %arg3[%c0_11, %c0_12, %c0_13] : memref<1x8x72xf32, #tpu.memory_space<vmem>>, vector<1x8x72xf32>
    %36 = vector.shape_cast %35 : vector<1x8x72xf32> to vector<8x72xf32>
    %cst = arith.constant dense<0.000000e+00> : vector<8x256xf32>
    %37 = tpu.matmul %36, %34, %cst {dimension_numbers = #tpu.dot_dimension_numbers<[1], [0], [0], [1], [0, 0, 1, 1], [], []>} : vector<8x72xf32>, vector<72x256xf32>, vector<8x256xf32> -> vector<8x256xf32>
    %c0_14 = arith.constant 0 : index
    %c0_15 = arith.constant 0 : index
    %38 = vector.load %arg4[%c0_14, %c0_15] : memref<8x1xf32, #tpu.memory_space<vmem>>, vector<8x1xf32>
    %39 = vector.broadcast %38 : vector<8x1xf32> to vector<8x256xf32>
    %40 = arith.addf %37, %39 : vector<8x256xf32>
    %cst_16 = arith.constant 0.000000e+00 : f32
    %41 = vector.broadcast %cst_16 : f32 to vector<8x256xf32>
    %42 = arith.maximumf %40, %41 : vector<8x256xf32>
    %c17_i32_17 = arith.constant 17 : i32
    %43 = tpu.dynamic_rotate %42 by %c17_i32_17 dim 1 : vector<8x256xf32>, i32 -> vector<8x256xf32>
    %44 = vector.broadcast %0 : vector<1x256xf32> to vector<8x256xf32>
    %45 = arith.mulf %43, %44 : vector<8x256xf32>
    %c16_i32_18 = arith.constant 16 : i32
    %46 = tpu.dynamic_rotate %42 by %c16_i32_18 dim 1 : vector<8x256xf32>, i32 -> vector<8x256xf32>
    %47 = vector.broadcast %1 : vector<1x256xf32> to vector<8x256xf32>
    %48 = arith.mulf %46, %47 : vector<8x256xf32>
    %c15_i32_19 = arith.constant 15 : i32
    %49 = tpu.dynamic_rotate %42 by %c15_i32_19 dim 1 : vector<8x256xf32>, i32 -> vector<8x256xf32>
    %50 = vector.broadcast %2 : vector<1x256xf32> to vector<8x256xf32>
    %51 = arith.mulf %49, %50 : vector<8x256xf32>
    %c1_i32_20 = arith.constant 1 : i32
    %52 = tpu.dynamic_rotate %42 by %c1_i32_20 dim 1 : vector<8x256xf32>, i32 -> vector<8x256xf32>
    %53 = vector.broadcast %3 : vector<1x256xf32> to vector<8x256xf32>
    %54 = arith.mulf %52, %53 : vector<8x256xf32>
    %c255_i32_21 = arith.constant 255 : i32
    %55 = tpu.dynamic_rotate %42 by %c255_i32_21 dim 1 : vector<8x256xf32>, i32 -> vector<8x256xf32>
    %56 = vector.broadcast %4 : vector<1x256xf32> to vector<8x256xf32>
    %57 = arith.mulf %55, %56 : vector<8x256xf32>
    %c241_i32_22 = arith.constant 241 : i32
    %58 = tpu.dynamic_rotate %42 by %c241_i32_22 dim 1 : vector<8x256xf32>, i32 -> vector<8x256xf32>
    %59 = vector.broadcast %5 : vector<1x256xf32> to vector<8x256xf32>
    %60 = arith.mulf %58, %59 : vector<8x256xf32>
    %c240_i32_23 = arith.constant 240 : i32
    %61 = tpu.dynamic_rotate %42 by %c240_i32_23 dim 1 : vector<8x256xf32>, i32 -> vector<8x256xf32>
    %62 = vector.broadcast %6 : vector<1x256xf32> to vector<8x256xf32>
    %63 = arith.mulf %61, %62 : vector<8x256xf32>
    %c239_i32_24 = arith.constant 239 : i32
    %64 = tpu.dynamic_rotate %42 by %c239_i32_24 dim 1 : vector<8x256xf32>, i32 -> vector<8x256xf32>
    %65 = vector.broadcast %7 : vector<1x256xf32> to vector<8x256xf32>
    %66 = arith.mulf %64, %65 : vector<8x256xf32>
    %67 = tpu.concatenate %45, %48, %51, %54, %42, %57, %60, %63, %66 in 0 : vector<8x256xf32>, vector<8x256xf32>, vector<8x256xf32>, vector<8x256xf32>, vector<8x256xf32>, vector<8x256xf32>, vector<8x256xf32>, vector<8x256xf32>, vector<8x256xf32> -> vector<72x256xf32>
    %c0_25 = arith.constant 0 : index
    %c0_26 = arith.constant 0 : index
    %c0_27 = arith.constant 0 : index
    %68 = vector.load %arg5[%c0_25, %c0_26, %c0_27] : memref<1x16x72xf32, #tpu.memory_space<vmem>>, vector<1x16x72xf32>
    %69 = vector.shape_cast %68 : vector<1x16x72xf32> to vector<16x72xf32>
    %cst_28 = arith.constant dense<0.000000e+00> : vector<16x256xf32>
    %70 = tpu.matmul %69, %67, %cst_28 {dimension_numbers = #tpu.dot_dimension_numbers<[1], [0], [0], [1], [0, 0, 1, 1], [], []>} : vector<16x72xf32>, vector<72x256xf32>, vector<16x256xf32> -> vector<16x256xf32>
    %c0_29 = arith.constant 0 : index
    %c0_30 = arith.constant 0 : index
    %71 = vector.load %arg6[%c0_29, %c0_30] : memref<16x1xf32, #tpu.memory_space<vmem>>, vector<16x1xf32>
    %72 = vector.broadcast %71 : vector<16x1xf32> to vector<16x256xf32>
    %73 = arith.addf %70, %72 : vector<16x256xf32>
    %cst_31 = arith.constant 0.000000e+00 : f32
    %74 = vector.broadcast %cst_31 : f32 to vector<16x256xf32>
    %75 = arith.maximumf %73, %74 : vector<16x256xf32>
    %c17_i32_32 = arith.constant 17 : i32
    %76 = tpu.dynamic_rotate %75 by %c17_i32_32 dim 1 : vector<16x256xf32>, i32 -> vector<16x256xf32>
    %77 = vector.broadcast %0 : vector<1x256xf32> to vector<16x256xf32>
    %78 = arith.mulf %76, %77 : vector<16x256xf32>
    %c16_i32_33 = arith.constant 16 : i32
    %79 = tpu.dynamic_rotate %75 by %c16_i32_33 dim 1 : vector<16x256xf32>, i32 -> vector<16x256xf32>
    %80 = vector.broadcast %1 : vector<1x256xf32> to vector<16x256xf32>
    %81 = arith.mulf %79, %80 : vector<16x256xf32>
    %c15_i32_34 = arith.constant 15 : i32
    %82 = tpu.dynamic_rotate %75 by %c15_i32_34 dim 1 : vector<16x256xf32>, i32 -> vector<16x256xf32>
    %83 = vector.broadcast %2 : vector<1x256xf32> to vector<16x256xf32>
    %84 = arith.mulf %82, %83 : vector<16x256xf32>
    %85 = tpu.concatenate %78, %81, %84 in 0 : vector<16x256xf32>, vector<16x256xf32>, vector<16x256xf32> -> vector<48x256xf32>
    %c0_35 = arith.constant 0 : index
    %c0_36 = arith.constant 0 : index
    %c0_37 = arith.constant 0 : index
    %86 = vector.load %arg7[%c0_35, %c0_36, %c0_37] : memref<3x32x48xf32, #tpu.memory_space<vmem>>, vector<1x32x48xf32>
    %87 = vector.shape_cast %86 : vector<1x32x48xf32> to vector<32x48xf32>
    %cst_38 = arith.constant dense<0.000000e+00> : vector<32x256xf32>
    %88 = tpu.matmul %87, %85, %cst_38 {dimension_numbers = #tpu.dot_dimension_numbers<[1], [0], [0], [1], [0, 0, 1, 1], [], []>} : vector<32x48xf32>, vector<48x256xf32>, vector<32x256xf32> -> vector<32x256xf32>
    %c1_i32_39 = arith.constant 1 : i32
    %89 = tpu.dynamic_rotate %75 by %c1_i32_39 dim 1 : vector<16x256xf32>, i32 -> vector<16x256xf32>
    %90 = vector.broadcast %3 : vector<1x256xf32> to vector<16x256xf32>
    %91 = arith.mulf %89, %90 : vector<16x256xf32>
    %c255_i32_40 = arith.constant 255 : i32
    %92 = tpu.dynamic_rotate %75 by %c255_i32_40 dim 1 : vector<16x256xf32>, i32 -> vector<16x256xf32>
    %93 = vector.broadcast %4 : vector<1x256xf32> to vector<16x256xf32>
    %94 = arith.mulf %92, %93 : vector<16x256xf32>
    %95 = tpu.concatenate %91, %75, %94 in 0 : vector<16x256xf32>, vector<16x256xf32>, vector<16x256xf32> -> vector<48x256xf32>
    %c1_41 = arith.constant 1 : index
    %c0_42 = arith.constant 0 : index
    %c0_43 = arith.constant 0 : index
    %96 = vector.load %arg7[%c1_41, %c0_42, %c0_43] : memref<3x32x48xf32, #tpu.memory_space<vmem>>, vector<1x32x48xf32>
    %97 = vector.shape_cast %96 : vector<1x32x48xf32> to vector<32x48xf32>
    %cst_44 = arith.constant dense<0.000000e+00> : vector<32x256xf32>
    %98 = tpu.matmul %97, %95, %cst_44 {dimension_numbers = #tpu.dot_dimension_numbers<[1], [0], [0], [1], [0, 0, 1, 1], [], []>} : vector<32x48xf32>, vector<48x256xf32>, vector<32x256xf32> -> vector<32x256xf32>
    %99 = arith.addf %88, %98 : vector<32x256xf32>
    %c241_i32_45 = arith.constant 241 : i32
    %100 = tpu.dynamic_rotate %75 by %c241_i32_45 dim 1 : vector<16x256xf32>, i32 -> vector<16x256xf32>
    %101 = vector.broadcast %5 : vector<1x256xf32> to vector<16x256xf32>
    %102 = arith.mulf %100, %101 : vector<16x256xf32>
    %c240_i32_46 = arith.constant 240 : i32
    %103 = tpu.dynamic_rotate %75 by %c240_i32_46 dim 1 : vector<16x256xf32>, i32 -> vector<16x256xf32>
    %104 = vector.broadcast %6 : vector<1x256xf32> to vector<16x256xf32>
    %105 = arith.mulf %103, %104 : vector<16x256xf32>
    %c239_i32_47 = arith.constant 239 : i32
    %106 = tpu.dynamic_rotate %75 by %c239_i32_47 dim 1 : vector<16x256xf32>, i32 -> vector<16x256xf32>
    %107 = vector.broadcast %7 : vector<1x256xf32> to vector<16x256xf32>
    %108 = arith.mulf %106, %107 : vector<16x256xf32>
    %109 = tpu.concatenate %102, %105, %108 in 0 : vector<16x256xf32>, vector<16x256xf32>, vector<16x256xf32> -> vector<48x256xf32>
    %c2_48 = arith.constant 2 : index
    %c0_49 = arith.constant 0 : index
    %c0_50 = arith.constant 0 : index
    %110 = vector.load %arg7[%c2_48, %c0_49, %c0_50] : memref<3x32x48xf32, #tpu.memory_space<vmem>>, vector<1x32x48xf32>
    %111 = vector.shape_cast %110 : vector<1x32x48xf32> to vector<32x48xf32>
    %cst_51 = arith.constant dense<0.000000e+00> : vector<32x256xf32>
    %112 = tpu.matmul %111, %109, %cst_51 {dimension_numbers = #tpu.dot_dimension_numbers<[1], [0], [0], [1], [0, 0, 1, 1], [], []>} : vector<32x48xf32>, vector<48x256xf32>, vector<32x256xf32> -> vector<32x256xf32>
    %113 = arith.addf %99, %112 : vector<32x256xf32>
    %c0_52 = arith.constant 0 : index
    %c0_53 = arith.constant 0 : index
    %114 = vector.load %arg8[%c0_52, %c0_53] : memref<32x1xf32, #tpu.memory_space<vmem>>, vector<32x1xf32>
    %115 = vector.broadcast %114 : vector<32x1xf32> to vector<32x256xf32>
    %116 = arith.addf %113, %115 : vector<32x256xf32>
    %cst_54 = arith.constant 0.000000e+00 : f32
    %117 = vector.broadcast %cst_54 : f32 to vector<32x256xf32>
    %118 = arith.maximumf %116, %117 : vector<32x256xf32>
    %c0_55 = arith.constant 0 : index
    %c0_56 = arith.constant 0 : index
    %c0_57 = arith.constant 0 : index
    %119 = vector.load %arg9[%c0_55, %c0_56, %c0_57] : memref<1x32x256xf32, #tpu.memory_space<vmem>>, vector<1x32x256xf32>
    %120 = vector.shape_cast %119 : vector<1x32x256xf32> to vector<32x256xf32>
    %121 = vector.shape_cast %118 : vector<32x256xf32> to vector<1x32x256xf32>
    tpu.vector_store %arg9[%c0_55, %c0_56, %c0_57], %121 {strides = array<i32>} : memref<1x32x256xf32, #tpu.memory_space<vmem>>, vector<1x32x256xf32>,
    return
  }
  func.func @transform_0(%arg0: i32) -> (i32, i32) {
    %c0_i32 = arith.constant 0 : i32
    %c0_i32_0 = arith.constant 0 : i32
    %c0_i32_1 = arith.constant 0 : i32
    return %c0_i32, %c0_i32_0 : i32, i32
  }
  func.func @transform_1(%arg0: i32) -> (i32, i32, i32) {
    %c0_i32 = arith.constant 0 : i32
    %c0_i32_0 = arith.constant 0 : i32
    %c0_i32_1 = arith.constant 0 : i32
    return %arg0, %c0_i32, %c0_i32_0 : i32, i32, i32
  }
  func.func @transform_2(%arg0: i32) -> (i32, i32, i32) {
    %c0_i32 = arith.constant 0 : i32
    %c0_i32_0 = arith.constant 0 : i32
    %c0_i32_1 = arith.constant 0 : i32
    %c0_i32_2 = arith.constant 0 : i32
    return %c0_i32, %c0_i32_0, %c0_i32_1 : i32, i32, i32
  }
  func.func @transform_3(%arg0: i32) -> (i32, i32) {
    %c0_i32 = arith.constant 0 : i32
    %c0_i32_0 = arith.constant 0 : i32
    %c0_i32_1 = arith.constant 0 : i32
    return %c0_i32, %c0_i32_0 : i32, i32
  }
  func.func @transform_4(%arg0: i32) -> (i32, i32, i32) {
    %c0_i32 = arith.constant 0 : i32
    %c0_i32_0 = arith.constant 0 : i32
    %c0_i32_1 = arith.constant 0 : i32
    %c0_i32_2 = arith.constant 0 : i32
    return %c0_i32, %c0_i32_0, %c0_i32_1 : i32, i32, i32
  }
  func.func @transform_5(%arg0: i32) -> (i32, i32) {
    %c0_i32 = arith.constant 0 : i32
    %c0_i32_0 = arith.constant 0 : i32
    %c0_i32_1 = arith.constant 0 : i32
    return %c0_i32, %c0_i32_0 : i32, i32
  }
  func.func @transform_6(%arg0: i32) -> (i32, i32, i32) {
    %c0_i32 = arith.constant 0 : i32
    %c0_i32_0 = arith.constant 0 : i32
    %c0_i32_1 = arith.constant 0 : i32
    %c0_i32_2 = arith.constant 0 : i32
    return %c0_i32, %c0_i32_0, %c0_i32_1 : i32, i32, i32
  }
  func.func @transform_7(%arg0: i32) -> (i32, i32) {
    %c0_i32 = arith.constant 0 : i32
    %c0_i32_0 = arith.constant 0 : i32
    %c0_i32_1 = arith.constant 0 : i32
    return %c0_i32, %c0_i32_0 : i32, i32
  }
  func.func @transform_8(%arg0: i32) -> (i32, i32, i32) {
    %c0_i32 = arith.constant 0 : i32
    %c0_i32_0 = arith.constant 0 : i32
    %c0_i32_1 = arith.constant 0 : i32
    return %arg0, %c0_i32, %c0_i32_0 : i32, i32, i32
  }
}

</mosaic_0001>

<bundles_post_ra>
// kernel: feature_extractor_forward.1
= control target key start
LH: loop header
LB: loop body
LE: loop exit
PB: predicated region body
PF: predicated region fallthrough
CT: control target
= control target key end

     0   :  { %s1240_s27 = smov 0   ;;  %s1787_s0 = inlined_call_operand.vmem [shape: f32[9,256], index: 0, kind: input, shape index: {}]   ;;  %s1788_s1 = inlined_call_operand.vmem [shape: f32[2,8,256], index: 1, kind: input, shape index: {}]   ;;  %s1789_s2 = inlined_call_operand.vmem [shape: f32[1,8,72], index: 2, kind: input, shape index: {}]   ;;  %s1790_s3 = inlined_call_operand.vmem [shape: f32[8,1], index: 3, kind: input, shape index: {}]   ;;  %s1791_s4 = inlined_call_operand.vmem [shape: f32[1,16,72], index: 4, kind: input, shape index: {}]   ;;  %s1792_s5 = inlined_call_operand.vmem [shape: f32[16,1], index: 5, kind: input, shape index: {}]   ;;  %s1793_s6 = inlined_call_operand.vmem [shape: f32[3,32,48], index: 6, kind: input, shape index: {}]   ;;  %s1794_s7 = inlined_call_operand.vmem [shape: f32[32,1], index: 7, kind: input, shape index: {}]   ;;  %s1795_s8 = inlined_call_operand.vmem [shape: f32[2,32,256], index: 8, kind: output, shape index: {}]  }
   0x1 LB: > { %s1088_s28 = sadd.s32 4294967295, %s1184_s27   ;;  %p1092_p0 = scmp.ge.s32.totalorder %s1184_s27, 1  ;;  %s1184_s27 = sphi %s1240_s27, %s18_s27  }
   0x2   : > { %p262_p1 = scmp.lt.s32.totalorder %s1184_s27, 3 }
   0x4   : > { %p263_p2 = pnand %p1092_p0, %p262_p1 }
   0x5   : > { %p296_p3 = scmp.lt.s32.totalorder (!%p263_p2), %s1088_s28, 1  ;;  %s1186_s11 = smov (!%p263_p2), 112  }
   0x6   : > { %266 = sbr.rel (%p263_p2) target bundleno = 952 (0x3b8), region = 52  ;;  %s1187_s12 = smov (!%p263_p2), 111  }
   0x7   : > { %s1188_s13 = smov (!%p263_p2), 113   ;;  %s1189_s14 = smov (!%p263_p2), 127  }
   0x8   : > { %s1190_s15 = smov (!%p263_p2), 1   ;;  %s1191_s16 = smov (!%p263_p2), 15  }
   0x9   : > { %s1192_s17 = smov (!%p263_p2), 16   ;;  %s1193_s18 = smov (!%p263_p2), 17  }
   0xb   : > { %s1797_s28 = smov (!%p296_p3, %s1088_s28), 1  ;;  %v327_v3 = vlaneseq  ;;  %v1103_v7 = vld [vmem:[%s1787_s0 + $0x10] ss:$8 sm:$0x3]  ;;  %v438_v35 = vld [vmem:[%s1790_s3] sm:$0xff]  ;;  %v1194_v36 = vmov 0  }
   0xc   : > { %s1144_s29 = sshll.u32 %s1797_s28, 4  ;;  %v1102_v9 = vld [vmem:[%s1787_s0 + $0x7] ss:$8 sm:$0x3]  ;;  %v1300_v10 = vperm.slane %v1103_v7, 0  ;;  %v1302_v11 = vperm.slane %v1103_v7, 1  ;;  %1175 = vset.pattern.permute.xlu1 %v1194_v36  ;;  %1176 = vset.pattern.permute.xlu0 %v1194_v36 }
   0xd   : > { %s300_s10 = scalar_lea.vmem %s1788_s1, %s1144_s29  ;;  %v1290_v6 = vand.u32 127, %v327_v3  ;;  %v1101_v12 = vld [vmem:[%s1787_s0 + $0x6] ss:$8 sm:$0x3]  ;;  %v1308_v15 = vperm.slane %v1102_v9, 0  ;;  %v1310_v16 = vperm.slane %v1102_v9, 1  ;;  %1177 = vset.pattern.permute.xlu2 %v1194_v36 }
   0xe   : > { %v1254_v0 = vld [vmem:[%s300_s10] sm:$0xff]  ;;  %v1262_v1 = vld [vmem:[%s300_s10 + $0x8] sm:$0xff]  ;;  %v1322_v23 = vperm.slane %v1101_v12, 0  ;;  %v1324_v24 = vperm.slane %v1101_v12, 1  ;;  %vm444_vm8 = vcmask 588800   ;;  %vm713_vm9 = vcmask 392192  }
   0xf   : > { %409 = vrot.lane.b32.xlu1 %v1254_v0, %s1186_s11  ;;  %423 = vrot.lane.b32.xlu0 %v1254_v0, %s1187_s12  ;;  %vm413_vm0 = vcmp.lt.s32.totalorder %v1290_v6, 112  ;;  %vm427_vm1 = vcmp.lt.s32.totalorder %v1290_v6, 111  ;;  %vm399_vm2 = vcmp.lt.s32.totalorder %v1290_v6, 113  ;;  %v1100_v27 = vld [vmem:[%s1787_s0 + $0x5] ss:$8 sm:$0x3] }
  0x10   : > { %395 = vrot.lane.b32.xlu2 %v1254_v0, %s1188_s13  ;;  %vm385_vm3 = vcmp.lt.s32.totalorder %v1290_v6, 127  ;;  %v1338_v33 = vperm.slane %v1100_v27, 0  ;;  %v1340_v34 = vperm.slane %v1100_v27, 1  ;;  %v1099_v43 = vld [vmem:[%s1787_s0 + $0x3] ss:$8 sm:$0x3] }
  0x11   : > { %v1098_v44 = vld [vmem:[%s1787_s0 + $0x2] ss:$8 sm:$0x3]  ;;  %vm371_vm4 = vcmp.lt.s32.totalorder %v1290_v6, 1  ;;  %v1358_v45 = vperm.slane %v1099_v43, 0  ;;  %v1362_v46 = vperm.slane %v1099_v43, 1 }
  0x12   : > { %vm357_vm5 = vcmp.lt.s32.totalorder %v1290_v6, 15  ;;  %v1365_v48 = vperm.slane %v1098_v44, 0  ;;  %v1367_v49 = vperm.slane %v1098_v44, 1  ;;  %v1097_v60 = vld [vmem:[%s1787_s0 + $0x1] ss:$8 sm:$0x3] }
  0x13   : > { %vm343_vm6 = vcmp.lt.s32.totalorder %v1290_v6, 16  ;;  %v1385_v61 = vperm.slane %v1097_v60, 0  ;;  %v1387_v62 = vperm.slane %v1097_v60, 1  ;;  %vm329_vm7 = vcmp.lt.s32.totalorder %v1290_v6, 17  ;;  %v988_v6 = vld [vmem:[%s1794_s7 + $0x18] sm:$0xff]  ;;  %s1145_s29 = sshll.u32 %s1797_s28, 6 }
  0x14   : > { %s1774_s10 = scalar_lea.vmem %s1795_s8, %s1145_s29 }
  0x17   : > { %411 = vrot.lane.b32.xlu1 %v1262_v1, %s1186_s11  ;;  %425 = vrot.lane.b32.xlu0 %v1262_v1, %s1187_s12 }
  0x18   : > { %397 = vrot.lane.b32.xlu2 %v1262_v1, %s1188_s13 }
  0x1f   : > { %383 = vrot.lane.b32.xlu1 %v1262_v1, %s1189_s14  ;;  %381 = vrot.lane.b32.xlu0 %v1254_v0, %s1189_s14 }
  0x20   : > { %367 = vrot.lane.b32.xlu2 %v1254_v0, %s1190_s15 }
  0x27   : > { %353 = vrot.lane.b32.xlu1 %v1254_v0, %s1191_s16  ;;  %369 = vrot.lane.b32.xlu0 %v1262_v1, %s1190_s15 }
  0x28   : > { %355 = vrot.lane.b32.xlu2 %v1262_v1, %s1191_s16 }
  0x2f   : > { %341 = vrot.lane.b32.xlu1 %v1262_v1, %s1192_s17  ;;  %339 = vrot.lane.b32.xlu0 %v1254_v0, %s1192_s17 }
  0x30   : > { %323 = vrot.lane.b32.xlu2 %v1254_v0, %s1193_s18 }
  0x37   : > { %325 = vrot.lane.b32.xlu0 %v1262_v1, %s1193_s18  ;;  %441 = vperm.xlu1 %1175, %v438_v35  }
  0x6a   : > { %v396_v2 = vpop.permute.xlu2 %395 }
  0x72   : > { %v398_v8 = vpop.permute.xlu2 %397 }
  0x73   : > { %v400_v25 = vsel %vm399_vm2, %v396_v2, %v398_v8  ;;  %v401_v26 = vsel %vm399_vm2, %v398_v8, %v396_v2 }
  0x74   : > { %v407_v31 = vmul.f32 %v1322_v23, %v400_v25  ;;  %v408_v32 = vmul.f32 %v1324_v24, %v401_v26 }
  0x7a   : > { %v368_v30 = vpop.permute.xlu2 %367 }
  0x81   : > { %v410_v4 = vpop.permute.xlu1 %409  ;;  %v424_v5 = vpop.permute.xlu0 %423 }
  0x82   : > { %v356_v47 = vpop.permute.xlu2 %355 }
  0x89   : > { %v412_v13 = vpop.permute.xlu1 %411  ;;  %v426_v14 = vpop.permute.xlu0 %425 }
  0x8a   : > { %v414_v17 = vsel %vm413_vm0, %v410_v4, %v412_v13  ;;  %v415_v18 = vsel %vm413_vm0, %v412_v13, %v410_v4  ;;  %v428_v19 = vsel %vm427_vm1, %v424_v5, %v426_v14  ;;  %v429_v20 = vsel %vm427_vm1, %v426_v14, %v424_v5  ;;  %v306_v5 = vld [vmem:[%s1787_s0] ss:$8 sm:$0x3]  ;;  %v324_v7 = vpop.permute.xlu2 %323 }
  0x8b   : > { %v435_v21 = vmul.f32 %v1300_v10, %v428_v19  ;;  %v436_v22 = vmul.f32 %v1302_v11, %v429_v20  ;;  %v421_v28 = vmul.f32 %v1308_v15, %v414_v17  ;;  %v422_v29 = vmul.f32 %v1310_v16, %v415_v18  ;;  %v437_v19 = vld [vmem:[%s1789_s2] sm:$0xff] }
  0x8c   : > { %v1399_v8 = vperm.slane %v306_v5, 0  ;;  %v1401_v9 = vperm.slane %v306_v5, 1 }
  0x8d   : > { %455 = vmatpush.msra.mxu0 %v435_v21  ;;  %475 = vmatpush.msra.mxu1 %v436_v22 }
  0x8f   : > { %456 = vmatpush.msra.mxu0 %v421_v28  ;;  %476 = vmatpush.msra.mxu1 %v422_v29  ;;  %v556_v29 = vld [vmem:[%s1792_s5] sm:$0xff] }
  0x91   : > { %v384_v37 = vpop.permute.xlu1 %383  ;;  %457 = vmatpush.msra.mxu0 %v407_v31  ;;  %477 = vmatpush.msra.mxu1 %v408_v32  ;;  %v382_v38 = vpop.permute.xlu0 %381 }
  0x92   : > { %v386_v39 = vsel %vm385_vm3, %v382_v38, %v384_v37  ;;  %v387_v40 = vsel %vm385_vm3, %v384_v37, %v382_v38 }
  0x93   : > { %v393_v41 = vmul.f32 %v1338_v33, %v386_v39  ;;  %v394_v42 = vmul.f32 %v1340_v34, %v387_v40 }
  0x95   : > { %458 = vmatpush.msra.mxu0 %v393_v41  ;;  %478 = vmatpush.msra.mxu1 %v394_v42 }
  0x97   : > { %459 = vmatpush.msra.mxu0 %v1254_v0  ;;  %479 = vmatpush.msra.mxu1 %v1262_v1 }
  0x99   : > { %v354_v50 = vpop.permute.xlu1 %353  ;;  %v370_v51 = vpop.permute.xlu0 %369 }
  0x9a   : > { %v372_v52 = vsel %vm371_vm4, %v368_v30, %v370_v51  ;;  %v373_v53 = vsel %vm371_vm4, %v370_v51, %v368_v30  ;;  %v358_v54 = vsel %vm357_vm5, %v354_v50, %v356_v47  ;;  %v359_v55 = vsel %vm357_vm5, %v356_v47, %v354_v50 }
  0x9b   : > { %v379_v56 = vmul.f32 %v1358_v45, %v373_v53  ;;  %v380_v57 = vmul.f32 %v1362_v46, %v372_v52  ;;  %v365_v58 = vmul.f32 %v1365_v48, %v359_v55  ;;  %v366_v59 = vmul.f32 %v1367_v49, %v358_v54 }
  0x9d   : > { %460 = vmatpush.msra.mxu0 %v379_v56  ;;  %480 = vmatpush.msra.mxu1 %v380_v57  ;;  %v557_v57 = vld [vmem:[%s1792_s5 + $0x8] sm:$0xff] }
  0x9f   : > { %461 = vmatpush.msra.mxu0 %v365_v58  ;;  %481 = vmatpush.msra.mxu1 %v366_v59 }
  0xa1   : > { %v342_v63 = vpop.permute.xlu1 %341  ;;  %v340_v0 = vpop.permute.xlu0 %339 }
  0xa2   : > { %v344_v1 = vsel %vm343_vm6, %v340_v0, %v342_v63  ;;  %v345_v2 = vsel %vm343_vm6, %v342_v63, %v340_v0 }
  0xa3   : > { %v351_v3 = vmul.f32 %v1385_v61, %v345_v2  ;;  %v352_v4 = vmul.f32 %v1387_v62, %v344_v1 }
  0xa5   : > { %462 = vmatpush.msra.mxu0 %v351_v3  ;;  %482 = vmatpush.msra.mxu1 %v352_v4 }
  0xa9   : > { %v326_v12 = vpop.permute.xlu0 %325  ;;  %v442_v20 = vpop.permute.xlu1 %441 }
  0xaa   : > { %v330_v13 = vsel %vm329_vm7, %v324_v7, %v326_v12  ;;  %v331_v14 = vsel %vm329_vm7, %v326_v12, %v324_v7 }
  0xab   : > { %v337_v17 = vmul.f32 %v1399_v8, %v331_v14  ;;  %v338_v18 = vmul.f32 %v1401_v9, %v330_v13 }
  0xad   : > { %463 = vmatpush.msra.mxu0 %v337_v17  ;;  %483 = vmatpush.msra.mxu1 %v338_v18 }
  0xae   : > { %1104 = vmatmul.msk.f32.vlgmr.msra.gmra.mxu0 %vm444_vm8, %v437_v19  ;;  %1105 = vmatmul.msk.f32.vlgmr.msra.gmra.mxu1 %vm444_vm8, %v437_v19 }
 0x12b   : > { %v465_v21 = vpop.f32.mrf.mxu0  ;;  %v485_v22 = vpop.f32.mrf.mxu1 }
 0x12c   : > { %v466_v25 = vadd.f32 %v465_v21, %v442_v20  ;;  %v486_v26 = vadd.f32 %v485_v22, %v442_v20 }
 0x12e   : > { %v488_v27 = vmax.f32 %v466_v25, 0.0  ;;  %v489_v28 = vmax.f32 %v486_v26, 0.0 }
 0x130   : > { %538 = vrot.lane.b32.xlu1 %v488_v27, %s1186_s11  ;;  %546 = vrot.lane.b32.xlu2 %v488_v27, %s1187_s12 }
 0x131   : > { %548 = vrot.lane.b32.xlu0 %v489_v28, %s1187_s12 }
 0x138   : > { %532 = vrot.lane.b32.xlu1 %v489_v28, %s1188_s13  ;;  %540 = vrot.lane.b32.xlu2 %v489_v28, %s1186_s11 }
 0x139   : > { %530 = vrot.lane.b32.xlu0 %v488_v27, %s1188_s13 }
 0x140   : > { %514 = vrot.lane.b32.xlu1 %v488_v27, %s1190_s15  ;;  %522 = vrot.lane.b32.xlu2 %v488_v27, %s1189_s14 }
 0x141   : > { %524 = vrot.lane.b32.xlu0 %v489_v28, %s1189_s14 }
 0x148   : > { %508 = vrot.lane.b32.xlu1 %v489_v28, %s1191_s16  ;;  %516 = vrot.lane.b32.xlu2 %v489_v28, %s1190_s15 }
 0x149   : > { %506 = vrot.lane.b32.xlu0 %v488_v27, %s1191_s16 }
 0x150   : > { %490 = vrot.lane.b32.xlu1 %v488_v27, %s1193_s18  ;;  %498 = vrot.lane.b32.xlu2 %v488_v27, %s1192_s17 }
 0x151   : > { %500 = vrot.lane.b32.xlu0 %v489_v28, %s1192_s17 }
 0x158   : > { %560 = vperm.xlu1 %1175, %v556_v29   ;;  %492 = vrot.lane.b32.xlu2 %v489_v28, %s1193_s18 }
 0x159   : > { %565 = vperm.xlu0 %1176, %v557_v57  }
 0x18a   : > { %v547_v30 = vpop.permute.xlu2 %546 }
 0x192   : > { %v541_v31 = vpop.permute.xlu2 %540 }
 0x19a   : > { %v523_v40 = vpop.permute.xlu2 %522 }
 0x1a2   : > { %v539_v32 = vpop.permute.xlu1 %538  ;;  %v517_v55 = vpop.permute.xlu2 %516 }
 0x1a3   : > { %v549_v35 = vpop.permute.xlu0 %548  ;;  %v542_v36 = vsel %vm413_vm0, %v539_v32, %v541_v31  ;;  %v543_v37 = vsel %vm413_vm0, %v541_v31, %v539_v32  ;;  %v554_v32 = vld [vmem:[%s1791_s4] sm:$0xff] }
 0x1a4   : > { %v550_v38 = vsel %vm427_vm1, %v547_v30, %v549_v35  ;;  %v551_v39 = vsel %vm427_vm1, %v549_v35, %v547_v30  ;;  %v544_v43 = vmul.f32 %v542_v36, %v1308_v15  ;;  %v545_v44 = vmul.f32 %v543_v37, %v1310_v16  ;;  %v555_v35 = vld [vmem:[%s1791_s4 + $0x8] sm:$0xff] }
 0x1a5   : > { %v552_v41 = vmul.f32 %v550_v38, %v1300_v10  ;;  %v553_v42 = vmul.f32 %v551_v39, %v1302_v11 }
 0x1a7   : > { %581 = vmatpush.msra.mxu2 %v552_v41  ;;  %604 = vmatpush.msra.mxu3 %v553_v42 }
 0x1a9   : > { %582 = vmatpush.msra.mxu2 %v544_v43  ;;  %605 = vmatpush.msra.mxu3 %v545_v44 }
 0x1aa   : > { %v533_v47 = vpop.permute.xlu1 %532  ;;  %v499_v3 = vpop.permute.xlu2 %498 }
 0x1ab   : > { %v531_v50 = vpop.permute.xlu0 %530 }
 0x1ac   : > { %v534_v51 = vsel %vm399_vm2, %v531_v50, %v533_v47  ;;  %v535_v52 = vsel %vm399_vm2, %v533_v47, %v531_v50 }
 0x1ad   : > { %v536_v53 = vmul.f32 %v534_v51, %v1322_v23  ;;  %v537_v54 = vmul.f32 %v535_v52, %v1324_v24 }
 0x1af   : > { %583 = vmatpush.msra.mxu2 %v536_v53  ;;  %606 = vmatpush.msra.mxu3 %v537_v54  ;;  %v986_v54 = vld [vmem:[%s1794_s7 + $0x8] sm:$0xff] }
 0x1b2   : > { %v515_v56 = vpop.permute.xlu1 %514  ;;  %v493_v20 = vpop.permute.xlu2 %492 }
 0x1b3   : > { %v525_v58 = vpop.permute.xlu0 %524  ;;  %v518_v1 = vsel %vm371_vm4, %v515_v56, %v517_v55  ;;  %v519_v2 = vsel %vm371_vm4, %v517_v55, %v515_v56  ;;  %v987_v55 = vld [vmem:[%s1794_s7 + $0x10] sm:$0xff] }
 0x1b4   : > { %v526_v59 = vsel %vm385_vm3, %v523_v40, %v525_v58  ;;  %v527_v60 = vsel %vm385_vm3, %v525_v58, %v523_v40  ;;  %v520_v4 = vmul.f32 %v519_v2, %v1358_v45  ;;  %v521_v5 = vmul.f32 %v518_v1, %v1362_v46 }
 0x1b5   : > { %v528_v63 = vmul.f32 %v526_v59, %v1338_v33  ;;  %v529_v0 = vmul.f32 %v527_v60, %v1340_v34 }
 0x1b7   : > { %584 = vmatpush.msra.mxu2 %v528_v63  ;;  %607 = vmatpush.msra.mxu3 %v529_v0 }
 0x1b9   : > { %585 = vmatpush.msra.mxu2 %v488_v27  ;;  %608 = vmatpush.msra.mxu3 %v489_v28 }
 0x1ba   : > { %v509_v7 = vpop.permute.xlu1 %508 }
 0x1bb   : > { %586 = vmatpush.msra.mxu2 %v520_v4  ;;  %609 = vmatpush.msra.mxu3 %v521_v5  ;;  %v507_v12 = vpop.permute.xlu0 %506 }
 0x1bc   : > { %v510_v13 = vsel %vm357_vm5, %v507_v12, %v509_v7  ;;  %v511_v14 = vsel %vm357_vm5, %v509_v7, %v507_v12 }
 0x1bd   : > { %v512_v17 = vmul.f32 %v511_v14, %v1365_v48  ;;  %v513_v18 = vmul.f32 %v510_v13, %v1367_v49 }
 0x1bf   : > { %587 = vmatpush.msra.mxu2 %v512_v17  ;;  %610 = vmatpush.msra.mxu3 %v513_v18 }
 0x1c2   : > { %v491_v19 = vpop.permute.xlu1 %490 }
 0x1c3   : > { %v501_v21 = vpop.permute.xlu0 %500  ;;  %v494_v22 = vsel %vm329_vm7, %v491_v19, %v493_v20  ;;  %v495_v25 = vsel %vm329_vm7, %v493_v20, %v491_v19 }
 0x1c4   : > { %v502_v26 = vsel %vm343_vm6, %v499_v3, %v501_v21  ;;  %v503_v27 = vsel %vm343_vm6, %v501_v21, %v499_v3  ;;  %v496_v30 = vmul.f32 %v495_v25, %v1399_v8  ;;  %v497_v31 = vmul.f32 %v494_v22, %v1401_v9 }
 0x1c5   : > { %v504_v28 = vmul.f32 %v503_v27, %v1385_v61  ;;  %v505_v29 = vmul.f32 %v502_v26, %v1387_v62 }
 0x1c7   : > { %588 = vmatpush.msra.mxu2 %v504_v28  ;;  %611 = vmatpush.msra.mxu3 %v505_v29 }
 0x1c9   : > { %589 = vmatpush.msra.mxu2 %v496_v30  ;;  %612 = vmatpush.msra.mxu3 %v497_v31 }
 0x1ca   : > { %1106 = vmatmul.msk.f32.vlgmr.msra.gmra.mxu2 %vm444_vm8, %v554_v32  ;;  %1108 = vmatmul.msk.f32.vlgmr.msra.gmra.mxu3 %vm444_vm8, %v554_v32  ;;  %v561_v36 = vpop.permute.xlu1 %560 }
 0x1cb   : > { %v566_v44 = vpop.permute.xlu0 %565 }
 0x1d2   : > { %1107 = vmatmul.msk.f32.gmra.mxu2 %vm444_vm8, %v555_v35  ;;  %1109 = vmatmul.msk.f32.gmra.mxu3 %vm444_vm8, %v555_v35 }
 0x24d   : > { %v591_v37 = vpop.f32.mrf.mxu2  ;;  %v614_v38 = vpop.f32.mrf.mxu3 }
 0x24e   : > { %v592_v39 = vadd.f32 %v591_v37, %v561_v36  ;;  %v615_v40 = vadd.f32 %v614_v38, %v561_v36  ;;  %v1112_v37 = vld [vmem:[%s1793_s6 + $0x30] sm:$0xff]  ;;  %v1110_v38 = vld [vmem:[%s1793_s6 + $0x20] sm:$0xff] }
 0x250   : > { %v1494_v41 = vmax.f32 %v592_v39, 0.0  ;;  %v1496_v42 = vmax.f32 %v615_v40, 0.0 }
 0x252   : > { %692 = vrot.lane.b32.xlu2 %v1494_v41, %s1189_s14  ;;  %680 = vrot.lane.b32.xlu1 %v1496_v42, %s1190_s15 }
 0x253   : > { %696 = vrot.lane.b32.xlu0 %v1496_v42, %s1189_s14 }
 0x255   : > { %v617_v43 = vpop.f32.mrf.mxu3  ;;  %v594_v51 = vpop.f32.mrf.mxu2 }
 0x256   : > { %v618_v47 = vadd.f32 %v617_v43, %v566_v44  ;;  %v595_v52 = vadd.f32 %v594_v51, %v566_v44 }
 0x258   : > { %v1516_v50 = vmax.f32 %v618_v47, 0.0  ;;  %v622_v53 = vmax.f32 %v595_v52, 0.0  ;;  %v1113_v52 = vld [vmem:[%s1793_s6 + $0x38] sm:$0xff] }
 0x25a   : > { %660 = vrot.lane.b32.xlu2 %v1496_v42, %s1191_s16  ;;  %656 = vrot.lane.b32.xlu1 %v1494_v41, %s1191_s16 }
 0x25b   : > { %676 = vrot.lane.b32.xlu0 %v1494_v41, %s1190_s15 }
 0x262   : > { %640 = vrot.lane.b32.xlu2 %v1494_v41, %s1192_s17  ;;  %886 = vrot.lane.b32.xlu1 %v1494_v41, %s1187_s12 }
 0x263   : > { %644 = vrot.lane.b32.xlu0 %v1496_v42, %s1192_s17 }
 0x26a   : > { %624 = vrot.lane.b32.xlu2 %v1494_v41, %s1193_s18  ;;  %698 = vrot.lane.b32.xlu1 %v1516_v50, %s1189_s14 }
 0x26b   : > { %628 = vrot.lane.b32.xlu0 %v1496_v42, %s1193_s18 }
 0x272   : > { %890 = vrot.lane.b32.xlu2 %v1496_v42, %s1187_s12  ;;  %678 = vrot.lane.b32.xlu1 %v622_v53, %s1190_s15 }
 0x273   : > { %874 = vrot.lane.b32.xlu0 %v1496_v42, %s1186_s11 }
 0x27a   : > { %870 = vrot.lane.b32.xlu2 %v1494_v41, %s1186_s11  ;;  %646 = vrot.lane.b32.xlu1 %v1516_v50, %s1192_s17 }
 0x27b   : > { %662 = vrot.lane.b32.xlu0 %v1516_v50, %s1191_s16 }
 0x282   : > { %626 = vrot.lane.b32.xlu1 %v622_v53, %s1193_s18  ;;  %694 = vrot.lane.b32.xlu2 %v622_v53, %s1189_s14 }
 0x283   : > { %642 = vrot.lane.b32.xlu0 %v622_v53, %s1192_s17 }
 0x28a   : > { %892 = vrot.lane.b32.xlu1 %v1516_v50, %s1187_s12  ;;  %682 = vrot.lane.b32.xlu2 %v1516_v50, %s1190_s15 }
 0x28b   : > { %888 = vrot.lane.b32.xlu0 %v622_v53, %s1187_s12 }
 0x292   : > { %876 = vrot.lane.b32.xlu1 %v1516_v50, %s1186_s11  ;;  %658 = vrot.lane.b32.xlu2 %v622_v53, %s1191_s16 }
 0x293   : > { %872 = vrot.lane.b32.xlu0 %v622_v53, %s1186_s11 }
 0x29a   : > { %856 = vrot.lane.b32.xlu1 %v622_v53, %s1188_s13  ;;  %630 = vrot.lane.b32.xlu2 %v1516_v50, %s1193_s18 }
 0x29b   : > { %854 = vrot.lane.b32.xlu0 %v1494_v41, %s1188_s13 }
 0x2a2   : > { %858 = vrot.lane.b32.xlu1 %v1496_v42, %s1188_s13  ;;  %860 = vrot.lane.b32.xlu2 %v1516_v50, %s1188_s13 }
 0x2a3   : > { %996 = vperm.xlu0 %1176, %v986_v54  }
 0x2aa   : > { %1001 = vperm.xlu1 %1175, %v987_v55  }
 0x2ac   : > { %v693_v56 = vpop.permute.xlu2 %692 }
 0x2b4   : > { %v1562_v57 = vpop.permute.xlu2 %660 }
 0x2bc   : > { %v1564_v58 = vpop.permute.xlu2 %640 }
 0x2c4   : > { %v1566_v59 = vpop.permute.xlu2 %624  ;;  %v681_v60 = vpop.permute.xlu1 %680 }
 0x2c5   : > { %v697_v63 = vpop.permute.xlu0 %696 }
 0x2c6   : > { %v700_v13 = vsel %vm385_vm3, %v693_v56, %v697_v63  ;;  %v702_v19 = vsel %vm385_vm3, %v697_v63, %v693_v56 }
 0x2c7   : > { %v704_v22 = vmul.f32 %v700_v13, %v1338_v33  ;;  %v705_v25 = vmul.f32 %v702_v19, %v1340_v34 }
 0x2cc   : > { %v1568_v0 = vpop.permute.xlu2 %890  ;;  %v1570_v1 = vpop.permute.xlu1 %656 }
 0x2cd   : > { %v677_v2 = vpop.permute.xlu0 %676 }
 0x2ce   : > { %v686_v28 = vsel %vm371_vm4, %v681_v60, %v677_v2  ;;  %v684_v30 = vsel %vm371_vm4, %v677_v2, %v681_v60 }
 0x2cf   : > { %v688_v35 = vmul.f32 %v686_v28, %v1358_v45  ;;  %v689_v36 = vmul.f32 %v684_v30, %v1362_v46  ;;  %v673_v28 = vld [vmem:[%s1793_s6 + $0x8] sm:$0xff] }
 0x2d4   : > { %v1572_v3 = vpop.permute.xlu2 %870  ;;  %v1574_v4 = vpop.permute.xlu1 %886 }
 0x2d5   : > { %v1576_v5 = vpop.permute.xlu0 %644 }
 0x2d6   : > { %v650_v56 = vsel %vm343_vm6, %v1576_v5, %v1564_v58 }
 0x2dc   : > { %v699_v7 = vpop.permute.xlu1 %698  ;;  %v695_v12 = vpop.permute.xlu2 %694 }
 0x2dd   : > { %v701_v14 = vsel %vm385_vm3, %v695_v12, %v699_v7  ;;  %v703_v17 = vsel %vm385_vm3, %v699_v7, %v695_v12  ;;  %v1584_v18 = vpop.permute.xlu0 %628  ;;  %v652_v12 = vmul.f32 %v650_v56, %v1385_v61 }
 0x2de   : > { %v706_v20 = vmul.f32 %v701_v14, %v1338_v33  ;;  %v707_v21 = vmul.f32 %v703_v17, %v1340_v34  ;;  %v634_v13 = vsel %vm329_vm7, %v1584_v18, %v1566_v59 }
 0x2e0   : > { %736 = vmatpush.msrb.mxu0 %v706_v20  ;;  %1146 = vmatpush.msrb.mxu2 %v706_v20 }
 0x2e1   : > { %765 = vmatpush.msrb.mxu1 %v707_v21  ;;  %1152 = vmatpush.msrb.mxu3 %v707_v21  ;;  %v672_v21 = vld [vmem:[%s1793_s6] sm:$0xff] }
 0x2e2   : > { %737 = vmatpush.msrb.mxu0 %v704_v22  ;;  %1147 = vmatpush.msrb.mxu2 %v704_v22 }
 0x2e3   : > { %766 = vmatpush.msrb.mxu1 %v705_v25  ;;  %1153 = vmatpush.msrb.mxu3 %v705_v25 }
 0x2e4   : > { %v679_v26 = vpop.permute.xlu1 %678  ;;  %v683_v27 = vpop.permute.xlu2 %682  ;;  %738 = vmatpush.msrb.mxu0 %v622_v53  ;;  %1148 = vmatpush.msrb.mxu2 %v622_v53  ;;  %v1111_v53 = vld [vmem:[%s1793_s6 + $0x28] sm:$0xff] }
 0x2e5   : > { %v685_v29 = vsel %vm371_vm4, %v679_v26, %v683_v27  ;;  %v687_v33 = vsel %vm371_vm4, %v683_v27, %v679_v26  ;;  %767 = vmatpush.msrb.mxu1 %v1516_v50  ;;  %1154 = vmatpush.msrb.mxu3 %v1516_v50  ;;  %v1600_v34 = vpop.permute.xlu0 %874 }
 0x2e6   : > { %739 = vmatpush.msrb.mxu0 %v1494_v41  ;;  %1149 = vmatpush.msrb.mxu2 %v1494_v41  ;;  %v690_v31 = vmul.f32 %v687_v33, %v1358_v45  ;;  %v691_v32 = vmul.f32 %v685_v29, %v1362_v46  ;;  %v664_v46 = vsel %vm357_vm5, %v1570_v1, %v1562_v57 }
 0x2e7   : > { %768 = vmatpush.msrb.mxu1 %v1496_v42  ;;  %1155 = vmatpush.msrb.mxu3 %v1496_v42  ;;  %v666_v41 = vsel %vm357_vm5, %v1562_v57, %v1570_v1  ;;  %v669_v51 = vmul.f32 %v664_v46, %v1367_v49  ;;  %v878_v29 = vsel %vm413_vm0, %v1572_v3, %v1600_v34 }
 0x2e8   : > { %740 = vmatpush.msrb.mxu0 %v690_v31  ;;  %1150 = vmatpush.msrb.mxu2 %v690_v31  ;;  %v668_v50 = vmul.f32 %v666_v41, %v1365_v48 }
 0x2e9   : > { %769 = vmatpush.msrb.mxu1 %v691_v32  ;;  %1156 = vmatpush.msrb.mxu3 %v691_v32  ;;  %v882_v32 = vmul.f32 %v878_v29, %v1308_v15 }
 0x2ea   : > { %741 = vmatpush.msrb.mxu0 %v688_v35  ;;  %1151 = vmatpush.msrb.mxu2 %v688_v35 }
 0x2eb   : > { %770 = vmatpush.msrb.mxu1 %v689_v36  ;;  %1157 = vmatpush.msrb.mxu3 %v689_v36 }
 0x2ec   : > { %v647_v39 = vpop.permute.xlu1 %646  ;;  %v659_v40 = vpop.permute.xlu2 %658  ;;  %1116 = vmatmul.msk.f32.vlgmr.msrb.gmra.mxu2 %vm713_vm9, %v1112_v37  ;;  %1120 = vmatmul.msk.f32.vlgmr.msrb.gmra.mxu3 %vm713_vm9, %v1112_v37 }
 0x2ed   : > { %v663_v45 = vpop.permute.xlu0 %662  ;;  %1114 = vmatmul.msk.f32.vlgmr.msrb.gmra.mxu0 %vm713_vm9, %v1110_v38  ;;  %1118 = vmatmul.msk.f32.vlgmr.msrb.gmra.mxu1 %vm713_vm9, %v1110_v38  ;;  %v674_v38 = vld [vmem:[%s1793_s6 + $0x10] sm:$0xff] }
 0x2ee   : > { %v665_v42 = vsel %vm357_vm5, %v659_v40, %v663_v45  ;;  %v667_v43 = vsel %vm357_vm5, %v663_v45, %v659_v40 }
 0x2ef   : > { %v670_v44 = vmul.f32 %v667_v43, %v1365_v48  ;;  %v671_v47 = vmul.f32 %v665_v42, %v1367_v49  ;;  %v648_v49 = vsel %vm343_vm6, %v1564_v58, %v1576_v5  ;;  %v632_v5 = vsel %vm329_vm7, %v1566_v59, %v1584_v18  ;;  %v675_v42 = vld [vmem:[%s1793_s6 + $0x18] sm:$0xff] }
 0x2f0   : > { %v653_v58 = vmul.f32 %v648_v49, %v1387_v62  ;;  %v637_v19 = vmul.f32 %v632_v5, %v1401_v9  ;;  %v894_v59 = vsel %vm427_vm1, %v1574_v4, %v1568_v0  ;;  %v896_v18 = vsel %vm427_vm1, %v1568_v0, %v1574_v4 }
 0x2f1   : > { %806 = vmatpush.msra.mxu2 %v670_v44  ;;  %835 = vmatpush.msra.mxu3 %v671_v47  ;;  %v898_v26 = vmul.f32 %v894_v59, %v1300_v10  ;;  %v899_v0 = vmul.f32 %v896_v18, %v1302_v11  ;;  %v1130_v47 = vld [vmem:[%s1793_s6 + $0x40] sm:$0xff] }
 0x2f3   : > { %807 = vmatpush.msra.mxu2 %v668_v50  ;;  %836 = vmatpush.msra.mxu3 %v669_v51  ;;  %v1133_v50 = vld [vmem:[%s1793_s6 + $0x58] sm:$0xff] }
 0x2f4   : > { %v627_v54 = vpop.permute.xlu1 %626  ;;  %1117 = vmatmul.msk.f32.gmra.mxu2 %vm713_vm9, %v1113_v52  ;;  %1121 = vmatmul.msk.f32.gmra.mxu3 %vm713_vm9, %v1113_v52  ;;  %v631_v48 = vpop.permute.xlu2 %630 }
 0x2f5   : > { %v643_v55 = vpop.permute.xlu0 %642  ;;  %1115 = vmatmul.msk.f32.gmra.mxu0 %vm713_vm9, %v1111_v53  ;;  %1119 = vmatmul.msk.f32.gmra.mxu1 %vm713_vm9, %v1111_v53  ;;  %v633_v2 = vsel %vm329_vm7, %v627_v54, %v631_v48  ;;  %v635_v7 = vsel %vm329_vm7, %v631_v48, %v627_v54 }
 0x2f6   : > { %v649_v57 = vsel %vm343_vm6, %v643_v55, %v647_v39  ;;  %v651_v60 = vsel %vm343_vm6, %v647_v39, %v643_v55  ;;  %v638_v14 = vmul.f32 %v635_v7, %v1399_v8  ;;  %v639_v17 = vmul.f32 %v633_v2, %v1401_v9  ;;  %v985_v39 = vld [vmem:[%s1794_s7] sm:$0xff] }
 0x2f7   : > { %v654_v63 = vmul.f32 %v651_v60, %v1385_v61  ;;  %v655_v1 = vmul.f32 %v649_v57, %v1387_v62  ;;  %v636_v62 = vmul.f32 %v634_v13, %v1399_v8  ;;  %991 = vperm.xlu2 %1177, %v985_v39  }
 0x2f9   : > { %808 = vmatpush.msra.mxu2 %v654_v63  ;;  %837 = vmatpush.msra.mxu3 %v655_v1 }
 0x2fb   : > { %809 = vmatpush.msra.mxu2 %v652_v12  ;;  %838 = vmatpush.msra.mxu3 %v653_v58 }
 0x2fc   : > { %v893_v61 = vpop.permute.xlu1 %892 }
 0x2fd   : > { %810 = vmatpush.msra.mxu2 %v638_v14  ;;  %839 = vmatpush.msra.mxu3 %v639_v17  ;;  %v889_v20 = vpop.permute.xlu0 %888 }
 0x2fe   : > { %v895_v8 = vsel %vm427_vm1, %v889_v20, %v893_v61  ;;  %v897_v9 = vsel %vm427_vm1, %v893_v61, %v889_v20 }
 0x2ff   : > { %v900_v22 = vmul.f32 %v895_v8, %v1300_v10  ;;  %v901_v25 = vmul.f32 %v897_v9, %v1302_v11  ;;  %811 = vmatpush.msra.mxu2 %v636_v62  ;;  %840 = vmatpush.msra.mxu3 %v637_v19  ;;  %v880_v10 = vsel %vm413_vm0, %v1600_v34, %v1572_v3  ;;  %v861_v3 = vpop.permute.xlu2 %860 }
 0x300   : > { %1122 = vmatmul.msk.f32.vlgmr.msra.gmra.mxu2 %vm713_vm9, %v672_v21  ;;  %1126 = vmatmul.msk.f32.vlgmr.msra.gmra.mxu3 %vm713_vm9, %v672_v21  ;;  %v883_v35 = vmul.f32 %v880_v10, %v1310_v16 }
 0x301   : > { %929 = vmatpush.msra.mxu0 %v900_v22  ;;  %958 = vmatpush.msra.mxu1 %v901_v25 }
 0x302   : > { %1006 = vperm.xlu2 %1177, %v988_v6  }
 0x303   : > { %930 = vmatpush.msra.mxu0 %v898_v26  ;;  %959 = vmatpush.msra.mxu1 %v899_v0 }
 0x304   : > { %v877_v4 = vpop.permute.xlu1 %876 }
 0x305   : > { %v873_v27 = vpop.permute.xlu0 %872 }
 0x306   : > { %v879_v11 = vsel %vm413_vm0, %v873_v27, %v877_v4  ;;  %v881_v33 = vsel %vm413_vm0, %v877_v4, %v873_v27 }
 0x307   : > { %v884_v30 = vmul.f32 %v879_v11, %v1308_v15  ;;  %v885_v31 = vmul.f32 %v881_v33, %v1310_v16 }
 0x308   : > { %1123 = vmatmul.msk.f32.gmra.mxu2 %vm713_vm9, %v673_v28  ;;  %1127 = vmatmul.msk.f32.gmra.mxu3 %vm713_vm9, %v673_v28 }
 0x309   : > { %931 = vmatpush.msra.mxu0 %v884_v30  ;;  %960 = vmatpush.msra.mxu1 %v885_v31 }
 0x30b   : > { %932 = vmatpush.msra.mxu0 %v882_v32  ;;  %961 = vmatpush.msra.mxu1 %v883_v35 }
 0x30c   : > { %v857_v34 = vpop.permute.xlu1 %856 }
 0x30d   : > { %v863_v36 = vsel %vm399_vm2, %v857_v34, %v861_v3  ;;  %v865_v37 = vsel %vm399_vm2, %v861_v3, %v857_v34  ;;  %v855_v40 = vpop.permute.xlu0 %854 }
 0x30e   : > { %v868_v15 = vmul.f32 %v863_v36, %v1322_v23  ;;  %v869_v16 = vmul.f32 %v865_v37, %v1324_v24 }
 0x310   : > { %1124 = vmatmul.msk.f32.gmra.mxu2 %vm713_vm9, %v674_v38  ;;  %1128 = vmatmul.msk.f32.gmra.mxu3 %vm713_vm9, %v674_v38 }
 0x311   : > { %933 = vmatpush.msra.mxu0 %v868_v15  ;;  %962 = vmatpush.msra.mxu1 %v869_v16 }
 0x314   : > { %v859_v45 = vpop.permute.xlu1 %858 }
 0x315   : > { %v862_v46 = vsel %vm399_vm2, %v855_v40, %v859_v45  ;;  %v864_v41 = vsel %vm399_vm2, %v859_v45, %v855_v40  ;;  %v997_v8 = vpop.permute.xlu0 %996 }
 0x316   : > { %v866_v43 = vmul.f32 %v862_v46, %v1322_v23  ;;  %v867_v44 = vmul.f32 %v864_v41, %v1324_v24  ;;  %v1131_v23 = vld [vmem:[%s1793_s6 + $0x48] sm:$0xff]  ;;  %v1132_v24 = vld [vmem:[%s1793_s6 + $0x50] sm:$0xff] }
 0x318   : > { %1125 = vmatmul.msk.f32.gmra.mxu2 %vm713_vm9, %v675_v42  ;;  %1129 = vmatmul.msk.f32.gmra.mxu3 %vm713_vm9, %v675_v42 }
 0x319   : > { %934 = vmatpush.msra.mxu0 %v866_v43  ;;  %963 = vmatpush.msra.mxu1 %v867_v44 }
 0x31a   : > { %1134 = vmatmul.msk.f32.vlgmr.msra.gmra.mxu0 %vm713_vm9, %v1130_v47  ;;  %1138 = vmatmul.msk.f32.vlgmr.msra.gmra.mxu1 %vm713_vm9, %v1130_v47 }
 0x31c   : > { %v1002_v32 = vpop.permute.xlu1 %1001 }
 0x322   : > { %1135 = vmatmul.msk.f32.gmra.mxu0 %vm713_vm9, %v1131_v23  ;;  %1139 = vmatmul.msk.f32.gmra.mxu1 %vm713_vm9, %v1131_v23 }
 0x32a   : > { %1136 = vmatmul.msk.f32.gmra.mxu0 %vm713_vm9, %v1132_v24  ;;  %1140 = vmatmul.msk.f32.gmra.mxu1 %vm713_vm9, %v1132_v24 }
 0x332   : > { %1137 = vmatmul.msk.f32.gmra.mxu0 %vm713_vm9, %v1133_v50  ;;  %1141 = vmatmul.msk.f32.gmra.mxu1 %vm713_vm9, %v1133_v50 }
 0x351   : > { %v992_v63 = vpop.permute.xlu2 %991 }
 0x35c   : > { %v1007_v41 = vpop.permute.xlu2 %1006 }
 0x36a   : > { %v743_v48 = vpop.f32.mrf.mxu0  ;;  %v772_v55 = vpop.f32.mrf.mxu1 }
 0x36f   : > { %v749_v51 = vpop.f32.mrf.mxu2  ;;  %v778_v52 = vpop.f32.mrf.mxu3 }
 0x372   : > { %v746_v57 = vpop.f32.mrf.mxu0  ;;  %v775_v60 = vpop.f32.mrf.mxu1 }
 0x377   : > { %v752_v53 = vpop.f32.mrf.mxu2  ;;  %v781_v54 = vpop.f32.mrf.mxu3 }
 0x383   : > { %v813_v49 = vpop.f32.mrf.mxu2  ;;  %v842_v56 = vpop.f32.mrf.mxu3 }
 0x384   : > { %v814_v1 = vadd.f32 %v813_v49, %v743_v48  ;;  %v843_v2 = vadd.f32 %v842_v56, %v772_v55 }
 0x38b   : > { %v816_v7 = vpop.f32.mrf.mxu2  ;;  %v845_v12 = vpop.f32.mrf.mxu3 }
 0x38c   : > { %v817_v20 = vadd.f32 %v816_v7, %v746_v57  ;;  %v846_v21 = vadd.f32 %v845_v12, %v775_v60 }
 0x393   : > { %v819_v25 = vpop.f32.mrf.mxu2  ;;  %v848_v26 = vpop.f32.mrf.mxu3 }
 0x394   : > { %v820_v29 = vadd.f32 %v819_v25, %v749_v51  ;;  %v849_v10 = vadd.f32 %v848_v26, %v778_v52 }
 0x397   : > { %v936_v58 = vpop.f32.mrf.mxu0  ;;  %v965_v5 = vpop.f32.mrf.mxu1 }
 0x398   : > { %v977_v13 = vadd.f32 %v936_v58, %v814_v1  ;;  %v978_v14 = vadd.f32 %v965_v5, %v843_v2 }
 0x39a   : > { %v1009_v17 = vadd.f32 %v992_v63, %v977_v13  ;;  %v1010_v61 = vadd.f32 %v992_v63, %v978_v14 }
 0x39b   : > { %v822_v34 = vpop.f32.mrf.mxu2  ;;  %v851_v36 = vpop.f32.mrf.mxu3 }
 0x39c   : > { %v1017_v62 = vmax.f32 %v1009_v17, 0.0  ;;  %v1018_v19 = vmax.f32 %v1010_v61, 0.0  ;;  %v823_v15 = vadd.f32 %v822_v34, %v752_v53  ;;  %v852_v16 = vadd.f32 %v851_v36, %v781_v54 }
 0x39e   : > { %1025 = vst [vmem:[%s1774_s10] sm:$0xff] %v1017_v62 }
 0x39f   : > { %1026 = vst [vmem:[%s1774_s10 + $0x8] sm:$0xff] %v1018_v19  ;;  %v939_v59 = vpop.f32.mrf.mxu0  ;;  %v968_v18 = vpop.f32.mrf.mxu1 }
 0x3a0   : > { %v979_v9 = vadd.f32 %v939_v59, %v817_v20  ;;  %v980_v22 = vadd.f32 %v968_v18, %v846_v21 }
 0x3a2   : > { %v1011_v0 = vadd.f32 %v997_v8, %v979_v9  ;;  %v1012_v4 = vadd.f32 %v997_v8, %v980_v22 }
 0x3a4   : > { %v1019_v27 = vmax.f32 %v1011_v0, 0.0  ;;  %v1020_v28 = vmax.f32 %v1012_v4, 0.0 }
 0x3a6   : > { %1027 = vst [vmem:[%s1774_s10 + $0x10] sm:$0xff] %v1019_v27 }
 0x3a7   : > { %1028 = vst [vmem:[%s1774_s10 + $0x18] sm:$0xff] %v1020_v28  ;;  %v942_v11 = vpop.f32.mrf.mxu0  ;;  %v971_v33 = vpop.f32.mrf.mxu1 }
 0x3a8   : > { %v981_v30 = vadd.f32 %v942_v11, %v820_v29  ;;  %v982_v31 = vadd.f32 %v971_v33, %v849_v10 }
 0x3aa   : > { %v1013_v35 = vadd.f32 %v1002_v32, %v981_v30  ;;  %v1014_v3 = vadd.f32 %v1002_v32, %v982_v31 }
 0x3ac   : > { %v1021_v37 = vmax.f32 %v1013_v35, 0.0  ;;  %v1022_v38 = vmax.f32 %v1014_v3, 0.0 }
 0x3ae   : > { %1029 = vst [vmem:[%s1774_s10 + $0x20] sm:$0xff] %v1021_v37 }
 0x3af   : > { %1030 = vst [vmem:[%s1774_s10 + $0x28] sm:$0xff] %v1022_v38  ;;  %v945_v39 = vpop.f32.mrf.mxu0  ;;  %v974_v40 = vpop.f32.mrf.mxu1 }
 0x3b0   : > { %v983_v45 = vadd.f32 %v945_v39, %v823_v15  ;;  %v984_v46 = vadd.f32 %v974_v40, %v852_v16 }
 0x3b2   : > { %v1015_v42 = vadd.f32 %v1007_v41, %v983_v45  ;;  %v1016_v43 = vadd.f32 %v1007_v41, %v984_v46 }
 0x3b4   : > { %v1023_v44 = vmax.f32 %v1015_v42, 0.0  ;;  %v1024_v47 = vmax.f32 %v1016_v43, 0.0 }
 0x3b6   : > { %1031 = vst [vmem:[%s1774_s10 + $0x30] sm:$0xff] %v1023_v44 }
 0x3b7   : > { %1032 = vst [vmem:[%s1774_s10 + $0x38] sm:$0xff] %v1024_v47 }
 0x3b8 PF: > { %s18_s27 = sadd.s32 1, %s1184_s27  }
 0x3b9   : > { %p15_p4 = scmp.ge.s32.totalorder %s18_s27, 4  }
 0x3bb   :  { %17 = sbr.rel (!%p15_p4) target bundleno = 1 (0x1), region = 91 }

</bundles_post_ra>
